<compile_context>
chip_gen: v7x
topology: tpu7x:2x2x1
jax: 0.10.0
libtpu: 0.0.40
codegen_flags: <defaults>
</compile_context>

<pallas_src>
import functools

import jax
import jax.numpy as jnp
from jax.experimental import pallas as pl
from jax.experimental.pallas import tpu as pltpu


# Well above what this kernel needs, below every generation's physical VMEM,
# and above v5e's 16 MiB scoped default.
_VMEM_LIMIT_BYTES = 48 * 1024 * 1024


@functools.lru_cache(maxsize=None)
def _probe_roll_convention():
    """Detects the lane-rotation convention of pltpu.roll on this backend.

    Returns True  if pltpu.roll(x, s, axis)[..., i] == x[..., i - s]  (jnp.roll),
            False if pltpu.roll(x, s, axis)[..., i] == x[..., i + s],
            None  if pltpu.roll does not lower here (use the slice fallback).
    """
    def k(x_ref, o_ref):
        o_ref[...] = pltpu.roll(x_ref[...], 1, axis=1)

    try:
        x = jax.lax.broadcasted_iota(jnp.float32, (8, 128), 1)
        out = pl.pallas_call(
            k, out_shape=jax.ShapeDtypeStruct((8, 128), jnp.float32))(x)
        out = jax.block_until_ready(out)
        o00, o01 = float(out[0, 0]), float(out[0, 1])
    except Exception:  # pragma: no cover - roll unsupported on this backend/version
        return None
    if o01 == 0.0 and o00 == 127.0:
        return True
    if o01 == 2.0 and o00 == 1.0:
        return False
    return None


def _inv_res_kernel(x_ref, w1_ref, w2_ref, o_ref, *, H, W, matmul_dtype,
                    roll_like_jnp):
    """One batch element per grid step.

    x_ref : (1, Cin, H*W)   lane-dense input (residual + conv branch share it)
    w1_ref: (Cmid, 9*Cin)   flipped/flattened ConvT3x3 weights (matmul_dtype)
    w2_ref: (Cout, Cmid)    ConvT1x1 weights (matmul_dtype)
    o_ref : (1, Cout, H*W)  lane-dense output
    """
    L = H * W
    cin = x_ref.shape[1]

    x = x_ref[0]                                    # (Cin, L) residual source
    xr = jnp.maximum(x, 0.0)                        # ReLU (f32, VPU)

    # Per-lane coordinates for the 3x3 halo masks (computed once, VPU only).
    lane = jax.lax.broadcasted_iota(jnp.int32, (cin, L), 1)
    col = lane % W
    ok_left = col >= 1                              # source col w-1 exists
    ok_right = col < (W - 1)                        # source col w+1 exists
    zero = jnp.zeros_like(xr)

    def shift(v, s):
        # y[:, l] = v[:, l+s] if 0 <= l+s < L else 0   (s static)
        if s == 0:
            return v
        if abs(s) >= L:                             # degenerate H==1 taps
            return zero
        if roll_like_jnp is not None:
            # One XLU lane rotation; zero the wrapped lanes on the VPU.
            amt = (-s) % L if roll_like_jnp else s % L
            y = pltpu.roll(v, amt, axis=1)
            ok = lane < (L - s) if s > 0 else lane >= (-s)
            return jnp.where(ok, y, zero)
        # Fallback: lane slice + concat (same zero-fill semantics).
        pad = jnp.zeros((cin, abs(s)), v.dtype)
        if s > 0:
            return jnp.concatenate([v[:, s:], pad], axis=1)
        return jnp.concatenate([pad, v[:, :L + s]], axis=1)

    # im2col: nine shifted/masked copies stacked on sublanes, built directly in
    # matmul_dtype -> (9*Cin, L).  Tap (dr, dc) is relu(x)[h+dr, w+dc] and pairs
    # with the flipped weight w1_pt[:, :, 1-dr, 1-dc], already folded into w1_ref
    # by the wrapper (same ordering: dr-major, dc-minor).
    taps = []
    for dr in (-1, 0, 1):
        for dc in (-1, 0, 1):
            t = shift(xr, dr * W + dc)
            if dc == -1:
                t = jnp.where(ok_left, t, zero)
            elif dc == 1:
                t = jnp.where(ok_right, t, zero)
            taps.append(t.astype(matmul_dtype))
    slab = jnp.concatenate(taps, axis=0)            # (9*Cin, L), matmul_dtype

    # ConvT(3x3) as one MXU matmul, f32 accumulate.
    h = jnp.dot(w1_ref[...], slab, preferred_element_type=jnp.float32)
    h = jnp.maximum(h, 0.0).astype(matmul_dtype)    # ReLU, back to MXU dtype

    # ConvT(1x1) as one MXU matmul.
    y = jnp.dot(w2_ref[...], h, preferred_element_type=jnp.float32)

    # Residual add with the raw (un-ReLU'd) input; lane-dense store.
    o_ref[0] = (x.astype(jnp.float32) + y).astype(o_ref.dtype)


def inverse_residual_layer(x_nchw, w1_pt, w2_pt, *, matmul_dtype=jnp.bfloat16):
    """x_nchw: (N, Cin, H, W); w1_pt: (Cin, Cmid, 3, 3); w2_pt: (Cmid, Cout, 1, 1).

    Use matmul_dtype=jnp.float32 for validation runs (tighter numerics).
    """
    N, Cin, H, W = x_nchw.shape
    Cmid = w1_pt.shape[1]
    Cout = w2_pt.shape[1]
    assert Cout == Cin, "residual add requires h_dim == in_dim"
    L = H * W

    # Tiny weight rewrites: ConvT(3x3,p=1) == Conv(3x3,p=1) with flipped kernel +
    # swapped channels:  w1r[oc, (a*3+b)*Cin + ic] = w1_pt[ic, oc, 2-a, 2-b].
    w1r = jnp.transpose(w1_pt[:, :, ::-1, ::-1], (1, 2, 3, 0)).reshape(Cmid, 9 * Cin)
    w2r = jnp.transpose(w2_pt[:, :, 0, 0], (1, 0))                # (Cout, Cmid)
    w1r = w1r.astype(matmul_dtype)
    w2r = w2r.astype(matmul_dtype)

    # Free metadata reshape: HW is contiguous in NCHW, so this is lane-dense.
    x_flat = x_nchw.reshape(N, Cin, L)

    roll_like_jnp = _probe_roll_convention()
    kernel = functools.partial(_inv_res_kernel, H=H, W=W,
                               matmul_dtype=matmul_dtype,
                               roll_like_jnp=roll_like_jnp)

    def make_call(single_buffer_weights):
        # Grid-invariant weights: a second pipeline buffer is pure VMEM waste.
        wkw = dict(pipeline_mode=pl.Buffered(1)) if single_buffer_weights else {}
        return pl.pallas_call(
            kernel,
            out_shape=jax.ShapeDtypeStruct((N, Cout, L), x_nchw.dtype),
            grid_spec=pltpu.PrefetchScalarGridSpec(
                num_scalar_prefetch=0,
                grid=(N,),
                in_specs=[
                    pl.BlockSpec((1, Cin, L), lambda n: (n, 0, 0)),
                    pl.BlockSpec((Cmid, 9 * Cin), lambda n: (0, 0), **wkw),
                    pl.BlockSpec((Cout, Cmid), lambda n: (0, 0), **wkw),
                ],
                out_specs=pl.BlockSpec((1, Cout, L), lambda n: (n, 0, 0)),
            ),
            compiler_params=pltpu.CompilerParams(
                dimension_semantics=("parallel",),
                vmem_limit_bytes=_VMEM_LIMIT_BYTES,
            ),
        )

    try:
        out_flat = make_call(True)(x_flat, w1r, w2r)
    except Exception:   # pragma: no cover - jax without Buffered(1) support here
        out_flat = make_call(False)(x_flat, w1r, w2r)

    # Free metadata reshape back to NCHW (no transpose needed).
    return out_flat.reshape(N, Cout, H, W)


def _reference(x_nchw, w1_pt, w2_pt):
    """Pure-JAX f32 reference straight from the ConvTranspose2d definition (NCHW)."""
    N, Cin, H, W = x_nchw.shape
    hi = jax.lax.Precision.HIGHEST
    xr = jnp.maximum(x_nchw, 0.0)
    xp = jnp.pad(xr, ((0, 0), (0, 0), (1, 1), (1, 1)))
    # out[n,oc,i,j] = sum_{ic,kh,kw} relu(x)[n,ic,i+1-kh,j+1-kw] * W1[ic,oc,kh,kw]
    out = jnp.zeros((N, w1_pt.shape[1], H, W), dtype=jnp.float32)
    for kh in range(3):
        for kw in range(3):
            sl = xp[:, :, 2 - kh:2 - kh + H, 2 - kw:2 - kw + W]
            out = out + jnp.einsum('nihw,io->nohw', sl, w1_pt[:, :, kh, kw],
                                   precision=hi)
    out = jnp.maximum(out, 0.0)
    out = jnp.einsum('nihw,io->nohw', out, w2_pt[:, :, 0, 0], precision=hi)
    return x_nchw + out


if __name__ == "__main__":
    key = jax.random.PRNGKey(0)
    k_x, k_w1, k_w2 = jax.random.split(key, 3)

    # Small shapes consistent with the module (residual add needs in_dim == h_dim).
    N, in_dim, h_dim, res_h_dim, H, W = 2, 8, 8, 16, 16, 16

    x = jax.random.normal(k_x, (N, in_dim, H, W), dtype=jnp.float32)
    # PyTorch ConvTranspose2d weight layout: (in_ch, out_ch, kH, kW), bias=False.
    w1 = 0.1 * jax.random.normal(k_w1, (in_dim, res_h_dim, 3, 3), dtype=jnp.float32)
    w2 = 0.1 * jax.random.normal(k_w2, (res_h_dim, h_dim, 1, 1), dtype=jnp.float32)

    out = inverse_residual_layer(x, w1, w2)          # bf16 MXU operands, f32 accum
    out = jax.block_until_ready(out)

    ref = _reference(x, w1, w2)
    assert out.shape == (N, h_dim, H, W)
    # bf16 matmul operands (f32 accumulate) -> relaxed tolerance vs the f32 reference.
    assert jnp.allclose(out, ref, atol=3e-2, rtol=3e-2), "mismatch vs reference"

    print("KERNEL_OK")
</pallas_src>

<mosaic_0001>
module attributes {stable_mosaic.version = 11 : i64} {
  func.func @k(%arg0: memref<8x128xf32, #tpu.memory_space<vmem>>, %arg1: memref<8x128xf32, #tpu.memory_space<vmem>>) attributes {dimension_semantics = [], scalar_prefetch = 0 : i64, scratch_operands = 0 : i64, tpu.core_type = #tpu.core_type<tc>} {
    %c0 = arith.constant 0 : index
    %c0_0 = arith.constant 0 : index
    %0 = vector.load %arg0[%c0, %c0_0] : memref<8x128xf32, #tpu.memory_space<vmem>>, vector<8x128xf32>
    %c1_i32 = arith.constant 1 : i32
    %1 = tpu.dynamic_rotate %0 by %c1_i32 dim 1 : vector<8x128xf32>, i32 -> vector<8x128xf32>
    %c0_1 = arith.constant 0 : index
    %c0_2 = arith.constant 0 : index
    %2 = vector.load %arg1[%c0_1, %c0_2] : memref<8x128xf32, #tpu.memory_space<vmem>>, vector<8x128xf32>
    tpu.vector_store %arg1[%c0_1, %c0_2], %1 {strides = array<i32>} : memref<8x128xf32, #tpu.memory_space<vmem>>, vector<8x128xf32>,
    return
  }
}

module attributes {stable_mosaic.version = 11 : i64} {
  func.func @_inv_res_kernel(%arg0: i32, %arg1: memref<1x8x256xf32, #tpu.memory_space<vmem>>, %arg2: memref<16x72xbf16, #tpu.memory_space<vmem>>, %arg3: memref<8x16xbf16, #tpu.memory_space<vmem>>, %arg4: memref<1x8x256xf32, #tpu.memory_space<vmem>>) attributes {dimension_semantics = [#tpu.dimension_semantics<parallel>], iteration_bounds = array<i64: 2>, scalar_prefetch = 0 : i64, scratch_operands = 0 : i64, tpu.core_type = #tpu.core_type<tc>, window_params = [{transform_indices = @transform_0, window_bounds = array<i64: 1, 8, 256>}, {pipeline_mode = #tpu.pipeline_mode<synchronous>, transform_indices = @transform_1, window_bounds = array<i64: 16, 72>}, {pipeline_mode = #tpu.pipeline_mode<synchronous>, transform_indices = @transform_2, window_bounds = array<i64: 8, 16>}, {transform_indices = @transform_3, window_bounds = array<i64: 1, 8, 256>}]} {
    %c0 = arith.constant 0 : index
    %c0_0 = arith.constant 0 : index
    %c0_1 = arith.constant 0 : index
    %0 = vector.load %arg1[%c0, %c0_0, %c0_1] : memref<1x8x256xf32, #tpu.memory_space<vmem>>, vector<1x8x256xf32>
    %1 = vector.shape_cast %0 : vector<1x8x256xf32> to vector<8x256xf32>
    %cst = arith.constant 0.000000e+00 : f32
    %2 = vector.broadcast %cst : f32 to vector<8x256xf32>
    %3 = arith.maximumf %1, %2 : vector<8x256xf32>
    %4 = tpu.iota {dimensions = array<i32: 1>} : vector<8x256xi32>
    %c16_i32 = arith.constant 16 : i32
    %c0_i32 = arith.constant 0 : i32
    %5 = arith.cmpi eq, %c16_i32, %c0_i32 : i32
    %c1_i32 = arith.constant 1 : i32
    %6 = arith.select %5, %c1_i32, %c16_i32 : i32
    %7 = vector.broadcast %6 : i32 to vector<8x256xi32>
    %8 = arith.remsi %4, %7 : vector<8x256xi32>
    %c0_i32_2 = arith.constant 0 : i32
    %9 = vector.broadcast %c0_i32_2 : i32 to vector<8x256xi32>
    %10 = arith.cmpi ne, %8, %9 : vector<8x256xi32>
    %c0_i32_3 = arith.constant 0 : i32
    %11 = vector.broadcast %c0_i32_3 : i32 to vector<8x256xi32>
    %12 = arith.cmpi slt, %8, %11 : vector<8x256xi32>
    %c0_i32_4 = arith.constant 0 : i32
    %13 = arith.cmpi slt, %6, %c0_i32_4 : i32
    %14 = vector.broadcast %13 : i1 to vector<8x256xi1>
    %15 = vector.broadcast %14 : vector<8x256xi1> to vector<8x256xi1>
    %16 = arith.xori %12, %15 : vector<8x256xi1>
    %17 = arith.andi %16, %10 : vector<8x256xi1>
    %18 = vector.broadcast %6 : i32 to vector<8x256xi32>
    %19 = arith.addi %8, %18 : vector<8x256xi32>
    %20 = arith.select %17, %19, %8 : vector<8x256xi1>, vector<8x256xi32>
    %c1_i32_5 = arith.constant 1 : i32
    %21 = vector.broadcast %c1_i32_5 : i32 to vector<8x256xi32>
    %22 = arith.cmpi sge, %20, %21 : vector<8x256xi32>
    %c15_i32 = arith.constant 15 : i32
    %23 = vector.broadcast %c15_i32 : i32 to vector<8x256xi32>
    %24 = arith.cmpi slt, %20, %23 : vector<8x256xi32>
    %cst_6 = arith.constant 0.000000e+00 : f32
    %25 = vector.broadcast %cst_6 : f32 to vector<8x256xf32>
    %cst_7 = arith.constant 0.000000e+00 : f32
    %26 = vector.broadcast %cst_7 : f32 to vector<8x17xf32>
    %27 = vector.extract_strided_slice %3 {offsets = [0, 0], sizes = [8, 239], strides = [1, 1]} : vector<8x256xf32> to vector<8x239xf32>
    %28 = tpu.concatenate %26, %27 in 1 : vector<8x17xf32>, vector<8x239xf32> -> vector<8x256xf32>
    %29 = arith.select %22, %28, %25 : vector<8x256xi1>, vector<8x256xf32>
    %30 = arith.truncf %29 : vector<8x256xf32> to vector<8x256xbf16>
    %cst_8 = arith.constant 0.000000e+00 : f32
    %31 = vector.broadcast %cst_8 : f32 to vector<8x16xf32>
    %32 = vector.extract_strided_slice %3 {offsets = [0, 0], sizes = [8, 240], strides = [1, 1]} : vector<8x256xf32> to vector<8x240xf32>
    %33 = tpu.concatenate %31, %32 in 1 : vector<8x16xf32>, vector<8x240xf32> -> vector<8x256xf32>
    %34 = arith.truncf %33 : vector<8x256xf32> to vector<8x256xbf16>
    %cst_9 = arith.constant 0.000000e+00 : f32
    %35 = vector.broadcast %cst_9 : f32 to vector<8x15xf32>
    %36 = vector.extract_strided_slice %3 {offsets = [0, 0], sizes = [8, 241], strides = [1, 1]} : vector<8x256xf32> to vector<8x241xf32>
    %37 = tpu.concatenate %35, %36 in 1 : vector<8x15xf32>, vector<8x241xf32> -> vector<8x256xf32>
    %38 = arith.select %24, %37, %25 : vector<8x256xi1>, vector<8x256xf32>
    %39 = arith.truncf %38 : vector<8x256xf32> to vector<8x256xbf16>
    %cst_10 = arith.constant 0.000000e+00 : f32
    %40 = vector.broadcast %cst_10 : f32 to vector<8x1xf32>
    %41 = vector.extract_strided_slice %3 {offsets = [0, 0], sizes = [8, 255], strides = [1, 1]} : vector<8x256xf32> to vector<8x255xf32>
    %42 = tpu.concatenate %40, %41 in 1 : vector<8x1xf32>, vector<8x255xf32> -> vector<8x256xf32>
    %43 = arith.select %22, %42, %25 : vector<8x256xi1>, vector<8x256xf32>
    %44 = arith.truncf %43 : vector<8x256xf32> to vector<8x256xbf16>
    %45 = arith.truncf %3 : vector<8x256xf32> to vector<8x256xbf16>
    %cst_11 = arith.constant 0.000000e+00 : f32
    %46 = vector.broadcast %cst_11 : f32 to vector<8x1xf32>
    %47 = vector.extract_strided_slice %3 {offsets = [0, 1], sizes = [8, 255], strides = [1, 1]} : vector<8x256xf32> to vector<8x255xf32>
    %48 = tpu.concatenate %47, %46 in 1 : vector<8x255xf32>, vector<8x1xf32> -> vector<8x256xf32>
    %49 = arith.select %24, %48, %25 : vector<8x256xi1>, vector<8x256xf32>
    %50 = arith.truncf %49 : vector<8x256xf32> to vector<8x256xbf16>
    %cst_12 = arith.constant 0.000000e+00 : f32
    %51 = vector.broadcast %cst_12 : f32 to vector<8x15xf32>
    %52 = vector.extract_strided_slice %3 {offsets = [0, 15], sizes = [8, 241], strides = [1, 1]} : vector<8x256xf32> to vector<8x241xf32>
    %53 = tpu.concatenate %52, %51 in 1 : vector<8x241xf32>, vector<8x15xf32> -> vector<8x256xf32>
    %54 = arith.select %22, %53, %25 : vector<8x256xi1>, vector<8x256xf32>
    %55 = arith.truncf %54 : vector<8x256xf32> to vector<8x256xbf16>
    %cst_13 = arith.constant 0.000000e+00 : f32
    %56 = vector.broadcast %cst_13 : f32 to vector<8x16xf32>
    %57 = vector.extract_strided_slice %3 {offsets = [0, 16], sizes = [8, 240], strides = [1, 1]} : vector<8x256xf32> to vector<8x240xf32>
    %58 = tpu.concatenate %57, %56 in 1 : vector<8x240xf32>, vector<8x16xf32> -> vector<8x256xf32>
    %59 = arith.truncf %58 : vector<8x256xf32> to vector<8x256xbf16>
    %cst_14 = arith.constant 0.000000e+00 : f32
    %60 = vector.broadcast %cst_14 : f32 to vector<8x17xf32>
    %61 = vector.extract_strided_slice %3 {offsets = [0, 17], sizes = [8, 239], strides = [1, 1]} : vector<8x256xf32> to vector<8x239xf32>
    %62 = tpu.concatenate %61, %60 in 1 : vector<8x239xf32>, vector<8x17xf32> -> vector<8x256xf32>
    %63 = arith.select %24, %62, %25 : vector<8x256xi1>, vector<8x256xf32>
    %64 = arith.truncf %63 : vector<8x256xf32> to vector<8x256xbf16>
    %65 = tpu.concatenate %30, %34, %39, %44, %45, %50, %55, %59, %64 in 0 : vector<8x256xbf16>, vector<8x256xbf16>, vector<8x256xbf16>, vector<8x256xbf16>, vector<8x256xbf16>, vector<8x256xbf16>, vector<8x256xbf16>, vector<8x256xbf16>, vector<8x256xbf16> -> vector<72x256xbf16>
    %c0_15 = arith.constant 0 : index
    %c0_16 = arith.constant 0 : index
    %66 = vector.load %arg2[%c0_15, %c0_16] : memref<16x72xbf16, #tpu.memory_space<vmem>>, vector<16x72xbf16>
    %cst_17 = arith.constant dense<0.000000e+00> : vector<16x256xf32>
    %67 = tpu.matmul %66, %65, %cst_17 {dimension_numbers = #tpu.dot_dimension_numbers<[1], [0], [0], [1], [0, 0, 1, 1], [], []>} : vector<16x72xbf16>, vector<72x256xbf16>, vector<16x256xf32> -> vector<16x256xf32>
    %cst_18 = arith.constant 0.000000e+00 : f32
    %68 = vector.broadcast %cst_18 : f32 to vector<16x256xf32>
    %69 = arith.maximumf %67, %68 : vector<16x256xf32>
    %70 = arith.truncf %69 : vector<16x256xf32> to vector<16x256xbf16>
    %c0_19 = arith.constant 0 : index
    %c0_20 = arith.constant 0 : index
    %71 = vector.load %arg3[%c0_19, %c0_20] : memref<8x16xbf16, #tpu.memory_space<vmem>>, vector<8x16xbf16>
    %cst_21 = arith.constant dense<0.000000e+00> : vector<8x256xf32>
    %72 = tpu.matmul %71, %70, %cst_21 {dimension_numbers = #tpu.dot_dimension_numbers<[1], [0], [0], [1], [0, 0, 1, 1], [], []>} : vector<8x16xbf16>, vector<16x256xbf16>, vector<8x256xf32> -> vector<8x256xf32>
    %73 = arith.addf %1, %72 : vector<8x256xf32>
    %c0_22 = arith.constant 0 : index
    %c0_23 = arith.constant 0 : index
    %c0_24 = arith.constant 0 : index
    %74 = vector.load %arg4[%c0_22, %c0_23, %c0_24] : memref<1x8x256xf32, #tpu.memory_space<vmem>>, vector<1x8x256xf32>
    %75 = vector.shape_cast %74 : vector<1x8x256xf32> to vector<8x256xf32>
    %76 = vector.shape_cast %73 : vector<8x256xf32> to vector<1x8x256xf32>
    tpu.vector_store %arg4[%c0_22, %c0_23, %c0_24], %76 {strides = array<i32>} : memref<1x8x256xf32, #tpu.memory_space<vmem>>, vector<1x8x256xf32>,
    return
  }
  func.func @transform_0(%arg0: i32) -> (i32, i32, i32) {
    %c0_i32 = arith.constant 0 : i32
    %c0_i32_0 = arith.constant 0 : i32
    %c0_i32_1 = arith.constant 0 : i32
    return %arg0, %c0_i32, %c0_i32_0 : i32, i32, i32
  }
  func.func @transform_1(%arg0: i32) -> (i32, i32) {
    %c0_i32 = arith.constant 0 : i32
    %c0_i32_0 = arith.constant 0 : i32
    %c0_i32_1 = arith.constant 0 : i32
    return %c0_i32, %c0_i32_0 : i32, i32
  }
  func.func @transform_2(%arg0: i32) -> (i32, i32) {
    %c0_i32 = arith.constant 0 : i32
    %c0_i32_0 = arith.constant 0 : i32
    %c0_i32_1 = arith.constant 0 : i32
    return %c0_i32, %c0_i32_0 : i32, i32
  }
  func.func @transform_3(%arg0: i32) -> (i32, i32, i32) {
    %c0_i32 = arith.constant 0 : i32
    %c0_i32_0 = arith.constant 0 : i32
    %c0_i32_1 = arith.constant 0 : i32
    return %arg0, %c0_i32, %c0_i32_0 : i32, i32, i32
  }
}

module attributes {stable_mosaic.version = 11 : i64} {
  func.func @_inv_res_kernel(%arg0: i32, %arg1: memref<1x8x256xf32, #tpu.memory_space<vmem>>, %arg2: memref<16x72xbf16, #tpu.memory_space<vmem>>, %arg3: memref<8x16xbf16, #tpu.memory_space<vmem>>, %arg4: memref<1x8x256xf32, #tpu.memory_space<vmem>>) attributes {dimension_semantics = [#tpu.dimension_semantics<parallel>], iteration_bounds = array<i64: 2>, scalar_prefetch = 0 : i64, scratch_operands = 0 : i64, tpu.core_type = #tpu.core_type<tc>, window_params = [{transform_indices = @transform_0, window_bounds = array<i64: 1, 8, 256>}, {pipeline_mode = #tpu.pipeline_mode<synchronous>, transform_indices = @transform_1, window_bounds = array<i64: 16, 72>}, {pipeline_mode = #tpu.pipeline_mode<synchronous>, transform_indices = @transform_2, window_bounds = array<i64: 8, 16>}, {transform_indices = @transform_3, window_bounds = array<i64: 1, 8, 256>}]} {
    %c0 = arith.constant 0 : index
    %c0_0 = arith.constant 0 : index
    %c0_1 = arith.constant 0 : index
    %0 = vector.load %arg1[%c0, %c0_0, %c0_1] : memref<1x8x256xf32, #tpu.memory_space<vmem>>, vector<1x8x256xf32>
    %1 = vector.shape_cast %0 : vector<1x8x256xf32> to vector<8x256xf32>
    %cst = arith.constant 0.000000e+00 : f32
    %2 = vector.broadcast %cst : f32 to vector<8x256xf32>
    %3 = arith.maximumf %1, %2 : vector<8x256xf32>
    %4 = tpu.iota {dimensions = array<i32: 1>} : vector<8x256xi32>
    %c16_i32 = arith.constant 16 : i32
    %c0_i32 = arith.constant 0 : i32
    %5 = arith.cmpi eq, %c16_i32, %c0_i32 : i32
    %c1_i32 = arith.constant 1 : i32
    %6 = arith.select %5, %c1_i32, %c16_i32 : i32
    %7 = vector.broadcast %6 : i32 to vector<8x256xi32>
    %8 = arith.remsi %4, %7 : vector<8x256xi32>
    %c0_i32_2 = arith.constant 0 : i32
    %9 = vector.broadcast %c0_i32_2 : i32 to vector<8x256xi32>
    %10 = arith.cmpi ne, %8, %9 : vector<8x256xi32>
    %c0_i32_3 = arith.constant 0 : i32
    %11 = vector.broadcast %c0_i32_3 : i32 to vector<8x256xi32>
    %12 = arith.cmpi slt, %8, %11 : vector<8x256xi32>
    %c0_i32_4 = arith.constant 0 : i32
    %13 = arith.cmpi slt, %6, %c0_i32_4 : i32
    %14 = vector.broadcast %13 : i1 to vector<8x256xi1>
    %15 = vector.broadcast %14 : vector<8x256xi1> to vector<8x256xi1>
    %16 = arith.xori %12, %15 : vector<8x256xi1>
    %17 = arith.andi %16, %10 : vector<8x256xi1>
    %18 = vector.broadcast %6 : i32 to vector<8x256xi32>
    %19 = arith.addi %8, %18 : vector<8x256xi32>
    %20 = arith.select %17, %19, %8 : vector<8x256xi1>, vector<8x256xi32>
    %c1_i32_5 = arith.constant 1 : i32
    %21 = vector.broadcast %c1_i32_5 : i32 to vector<8x256xi32>
    %22 = arith.cmpi sge, %20, %21 : vector<8x256xi32>
    %c15_i32 = arith.constant 15 : i32
    %23 = vector.broadcast %c15_i32 : i32 to vector<8x256xi32>
    %24 = arith.cmpi slt, %20, %23 : vector<8x256xi32>
    %cst_6 = arith.constant 0.000000e+00 : f32
    %25 = vector.broadcast %cst_6 : f32 to vector<8x256xf32>
    %cst_7 = arith.constant 0.000000e+00 : f32
    %26 = vector.broadcast %cst_7 : f32 to vector<8x17xf32>
    %27 = vector.extract_strided_slice %3 {offsets = [0, 0], sizes = [8, 239], strides = [1, 1]} : vector<8x256xf32> to vector<8x239xf32>
    %28 = tpu.concatenate %26, %27 in 1 : vector<8x17xf32>, vector<8x239xf32> -> vector<8x256xf32>
    %29 = arith.select %22, %28, %25 : vector<8x256xi1>, vector<8x256xf32>
    %30 = arith.truncf %29 : vector<8x256xf32> to vector<8x256xbf16>
    %cst_8 = arith.constant 0.000000e+00 : f32
    %31 = vector.broadcast %cst_8 : f32 to vector<8x16xf32>
    %32 = vector.extract_strided_slice %3 {offsets = [0, 0], sizes = [8, 240], strides = [1, 1]} : vector<8x256xf32> to vector<8x240xf32>
    %33 = tpu.concatenate %31, %32 in 1 : vector<8x16xf32>, vector<8x240xf32> -> vector<8x256xf32>
    %34 = arith.truncf %33 : vector<8x256xf32> to vector<8x256xbf16>
    %cst_9 = arith.constant 0.000000e+00 : f32
    %35 = vector.broadcast %cst_9 : f32 to vector<8x15xf32>
    %36 = vector.extract_strided_slice %3 {offsets = [0, 0], sizes = [8, 241], strides = [1, 1]} : vector<8x256xf32> to vector<8x241xf32>
    %37 = tpu.concatenate %35, %36 in 1 : vector<8x15xf32>, vector<8x241xf32> -> vector<8x256xf32>
    %38 = arith.select %24, %37, %25 : vector<8x256xi1>, vector<8x256xf32>
    %39 = arith.truncf %38 : vector<8x256xf32> to vector<8x256xbf16>
    %cst_10 = arith.constant 0.000000e+00 : f32
    %40 = vector.broadcast %cst_10 : f32 to vector<8x1xf32>
    %41 = vector.extract_strided_slice %3 {offsets = [0, 0], sizes = [8, 255], strides = [1, 1]} : vector<8x256xf32> to vector<8x255xf32>
    %42 = tpu.concatenate %40, %41 in 1 : vector<8x1xf32>, vector<8x255xf32> -> vector<8x256xf32>
    %43 = arith.select %22, %42, %25 : vector<8x256xi1>, vector<8x256xf32>
    %44 = arith.truncf %43 : vector<8x256xf32> to vector<8x256xbf16>
    %45 = arith.truncf %3 : vector<8x256xf32> to vector<8x256xbf16>
    %cst_11 = arith.constant 0.000000e+00 : f32
    %46 = vector.broadcast %cst_11 : f32 to vector<8x1xf32>
    %47 = vector.extract_strided_slice %3 {offsets = [0, 1], sizes = [8, 255], strides = [1, 1]} : vector<8x256xf32> to vector<8x255xf32>
    %48 = tpu.concatenate %47, %46 in 1 : vector<8x255xf32>, vector<8x1xf32> -> vector<8x256xf32>
    %49 = arith.select %24, %48, %25 : vector<8x256xi1>, vector<8x256xf32>
    %50 = arith.truncf %49 : vector<8x256xf32> to vector<8x256xbf16>
    %cst_12 = arith.constant 0.000000e+00 : f32
    %51 = vector.broadcast %cst_12 : f32 to vector<8x15xf32>
    %52 = vector.extract_strided_slice %3 {offsets = [0, 15], sizes = [8, 241], strides = [1, 1]} : vector<8x256xf32> to vector<8x241xf32>
    %53 = tpu.concatenate %52, %51 in 1 : vector<8x241xf32>, vector<8x15xf32> -> vector<8x256xf32>
    %54 = arith.select %22, %53, %25 : vector<8x256xi1>, vector<8x256xf32>
    %55 = arith.truncf %54 : vector<8x256xf32> to vector<8x256xbf16>
    %cst_13 = arith.constant 0.000000e+00 : f32
    %56 = vector.broadcast %cst_13 : f32 to vector<8x16xf32>
    %57 = vector.extract_strided_slice %3 {offsets = [0, 16], sizes = [8, 240], strides = [1, 1]} : vector<8x256xf32> to vector<8x240xf32>
    %58 = tpu.concatenate %57, %56 in 1 : vector<8x240xf32>, vector<8x16xf32> -> vector<8x256xf32>
    %59 = arith.truncf %58 : vector<8x256xf32> to vector<8x256xbf16>
    %cst_14 = arith.constant 0.000000e+00 : f32
    %60 = vector.broadcast %cst_14 : f32 to vector<8x17xf32>
    %61 = vector.extract_strided_slice %3 {offsets = [0, 17], sizes = [8, 239], strides = [1, 1]} : vector<8x256xf32> to vector<8x239xf32>
    %62 = tpu.concatenate %61, %60 in 1 : vector<8x239xf32>, vector<8x17xf32> -> vector<8x256xf32>
    %63 = arith.select %24, %62, %25 : vector<8x256xi1>, vector<8x256xf32>
    %64 = arith.truncf %63 : vector<8x256xf32> to vector<8x256xbf16>
    %65 = tpu.concatenate %30, %34, %39, %44, %45, %50, %55, %59, %64 in 0 : vector<8x256xbf16>, vector<8x256xbf16>, vector<8x256xbf16>, vector<8x256xbf16>, vector<8x256xbf16>, vector<8x256xbf16>, vector<8x256xbf16>, vector<8x256xbf16>, vector<8x256xbf16> -> vector<72x256xbf16>
    %c0_15 = arith.constant 0 : index
    %c0_16 = arith.constant 0 : index
    %66 = vector.load %arg2[%c0_15, %c0_16] : memref<16x72xbf16, #tpu.memory_space<vmem>>, vector<16x72xbf16>
    %cst_17 = arith.constant dense<0.000000e+00> : vector<16x256xf32>
    %67 = tpu.matmul %66, %65, %cst_17 {dimension_numbers = #tpu.dot_dimension_numbers<[1], [0], [0], [1], [0, 0, 1, 1], [], []>} : vector<16x72xbf16>, vector<72x256xbf16>, vector<16x256xf32> -> vector<16x256xf32>
    %cst_18 = arith.constant 0.000000e+00 : f32
    %68 = vector.broadcast %cst_18 : f32 to vector<16x256xf32>
    %69 = arith.maximumf %67, %68 : vector<16x256xf32>
    %70 = arith.truncf %69 : vector<16x256xf32> to vector<16x256xbf16>
    %c0_19 = arith.constant 0 : index
    %c0_20 = arith.constant 0 : index
    %71 = vector.load %arg3[%c0_19, %c0_20] : memref<8x16xbf16, #tpu.memory_space<vmem>>, vector<8x16xbf16>
    %cst_21 = arith.constant dense<0.000000e+00> : vector<8x256xf32>
    %72 = tpu.matmul %71, %70, %cst_21 {dimension_numbers = #tpu.dot_dimension_numbers<[1], [0], [0], [1], [0, 0, 1, 1], [], []>} : vector<8x16xbf16>, vector<16x256xbf16>, vector<8x256xf32> -> vector<8x256xf32>
    %73 = arith.addf %1, %72 : vector<8x256xf32>
    %c0_22 = arith.constant 0 : index
    %c0_23 = arith.constant 0 : index
    %c0_24 = arith.constant 0 : index
    %74 = vector.load %arg4[%c0_22, %c0_23, %c0_24] : memref<1x8x256xf32, #tpu.memory_space<vmem>>, vector<1x8x256xf32>
    %75 = vector.shape_cast %74 : vector<1x8x256xf32> to vector<8x256xf32>
    %76 = vector.shape_cast %73 : vector<8x256xf32> to vector<1x8x256xf32>
    tpu.vector_store %arg4[%c0_22, %c0_23, %c0_24], %76 {strides = array<i32>} : memref<1x8x256xf32, #tpu.memory_space<vmem>>, vector<1x8x256xf32>,
    return
  }
  func.func @transform_0(%arg0: i32) -> (i32, i32, i32) {
    %c0_i32 = arith.constant 0 : i32
    %c0_i32_0 = arith.constant 0 : i32
    %c0_i32_1 = arith.constant 0 : i32
    return %arg0, %c0_i32, %c0_i32_0 : i32, i32, i32
  }
  func.func @transform_1(%arg0: i32) -> (i32, i32) {
    %c0_i32 = arith.constant 0 : i32
    %c0_i32_0 = arith.constant 0 : i32
    %c0_i32_1 = arith.constant 0 : i32
    return %c0_i32, %c0_i32_0 : i32, i32
  }
  func.func @transform_2(%arg0: i32) -> (i32, i32) {
    %c0_i32 = arith.constant 0 : i32
    %c0_i32_0 = arith.constant 0 : i32
    %c0_i32_1 = arith.constant 0 : i32
    return %c0_i32, %c0_i32_0 : i32, i32
  }
  func.func @transform_3(%arg0: i32) -> (i32, i32, i32) {
    %c0_i32 = arith.constant 0 : i32
    %c0_i32_0 = arith.constant 0 : i32
    %c0_i32_1 = arith.constant 0 : i32
    return %arg0, %c0_i32, %c0_i32_0 : i32, i32, i32
  }
}

</mosaic_0001>

<bundles_post_ra>
// kernel: tpu_custom_call.1
= control target key start
LH: loop header
LB: loop body
LE: loop exit
PB: predicated region body
PF: predicated region fallthrough
CT: control target
= control target key end

     0   :  { %6 = vsyncpa [#allocation3], 0  ;;  %s128_s0 = inlined_call_operand.hbm [shape: f32[8,128], index: 0, kind: input, shape index: {}]   ;;  %s129_s1 = inlined_call_operand.hbm [shape: f32[8,128], index: 1, kind: output, shape index: {}]  }
   0x1   :  { %7 = vsyncpa [#allocation4], 0  ;;  %s91_s6 = smov [#allocation2]   ;;  %s43_s10 = scalar_lea.hbm %s128_s0, 128 }
   0x2   :  { %s14_s7 = sshll.u32 %s91_s6, 4  ;;  %p44_p0 = scmp.ne.s32.totalorder %s128_s0, %s43_s10  ;;  %s15_s7 = int_to_ptr.vmem [resolvable:$true] %s14_s7 }
   0x3   :  { %p47_p1 = scmp.lt.u32.totalorder %s43_s10, %s128_s0 }
   0x5   :  { %p49_p2 = pnand %p47_p1, %p44_p0 }
   0x7   :  { %52 = shalt.err (!%p49_p2)
}
   0x8   :  { %s53_s15 = scalar_lea.vmem %s15_s7, 128  ;;  %p58_p4 = scmp.lt.s32.totalorder %s15_s7, %s15_s7 }
   0x9   :  { %p54_p3 = scmp.ne.s32.totalorder %s15_s7, %s53_s15  ;;  %p59_p5 = scmp.lt.s32.totalorder %s53_s15, %s53_s15 }
   0xb   :  { %p60_p6 = por %p59_p5, %p58_p4 }
   0xd   :  { %p61_p7 = pnand %p60_p6, %p54_p3 }
   0xf   :  { %64 = shalt.err (!%p61_p7)
}
  0x10   :  { %17 = dma.hbm_to_vmem [thread:$0]  %s128_s0, 128, %s15_s7, [#allocation3]  }
  0x11   :  { %87 = dma.done.wait [#allocation3], 128  }
  0x12   :  { %88 = vsyncadd [#allocation3], 4294967168  ;;  %v21_v0 = vld [vmem:[#allocation2] sm:$0xff]  ;;  %s92_s18 = smov 1   ;;  %s93_s19 = smov [#allocation5]  }
  0x13   :  { %22 = vrot.lane.b32.xlu0 %v21_v0, %s92_s18  ;;  %s31_s20 = sshll.u32 %s93_s19, 4  ;;  %s32_s20 = int_to_ptr.vmem [resolvable:$true] %s31_s20 }
  0x14   :  { %s65_s21 = scalar_lea.vmem %s32_s20, 128  ;;  %p70_p9 = scmp.lt.s32.totalorder %s32_s20, %s32_s20 }
  0x15   :  { %p66_p8 = scmp.ne.s32.totalorder %s32_s20, %s65_s21  ;;  %p71_p10 = scmp.lt.s32.totalorder %s65_s21, %s65_s21 }
  0x17   :  { %p72_p11 = por %p71_p10, %p70_p9 }
  0x19   :  { %p73_p12 = pnand %p72_p11, %p66_p8 }
  0x85   :  { %v23_v1 = vpop.permute.xlu0 %22 }
  0x86   :  { %24 = vst [vmem:[#allocation5] sm:$0xff] %v23_v1 }
  0x87   :  { %76 = shalt.err (!%p73_p12)
}
  0x88   :  { %s77_s0 = scalar_lea.hbm %s129_s1, 128 }
  0x89   :  { %p78_p13 = scmp.ne.s32.totalorder %s129_s1, %s77_s0  ;;  %p81_p0 = scmp.lt.u32.totalorder %s77_s0, %s129_s1 }
  0x8b   :  { %p83_p1 = pnand %p81_p0, %p78_p13 }
  0x8d   :  { %86 = shalt.err (!%p83_p1)
}
  0x8e   :  { %34 = dma.vmem_to_hbm [thread:$0]  %s32_s20, 128, %s129_s1, [#allocation4]  }
  0x8f   :  { %89 = dma.done.wait [#allocation4], 128  }
  0x90   :  { %90 = vsyncadd [#allocation4], 4294967168 }
  0x91   :  { %38 = vsyncpa [#allocation3], 1 }
  0x92   :  { %39 = vsyncpa [#allocation4], 1 }

// kernel: tpu_custom_call.1
= control target key start
LH: loop header
LB: loop body
LE: loop exit
PB: predicated region body
PF: predicated region fallthrough
CT: control target
= control target key end

     0   :  { %8 = vsyncpa [#allocation3], 0  ;;  %s1184_s0 = inlined_call_operand.hbm [shape: f32[2,8,256], index: 0, kind: input, shape index: {}]   ;;  %s1185_s1 = inlined_call_operand.hbm [shape: bf16[16,72], index: 1, kind: input, shape index: {}]   ;;  %s1186_s2 = inlined_call_operand.vmem [shape: bf16[8,16], index: 2, kind: input, shape index: {}]   ;;  %s1187_s3 = inlined_call_operand.hbm [shape: f32[2,8,256], index: 3, kind: output, shape index: {}]  }
   0x1   :  { %10 = vsyncpa [#allocation3 + $0x1], 0 }
   0x2   :  { %11 = vsyncpa [#allocation6], 0 }
   0x3   :  { %12 = vsyncpa [#allocation4], 0 }
   0x4   :  { %14 = vsyncpa [#allocation4 + $0x1], 0  ;;  %s896_s12 = smov 0   ;;  %s898_s13 = smov 0  }
   0x5   :  { %s900_s14 = smov 0   ;;  %s902_s15 = smov 0  }
   0x6 LB: > { %s917_s16 = sadd.s32 4294967295, %s860_s15   ;;  %s601_s17 = sadd.s32 4294967294, %s860_s15   ;;  %s860_s15 = sphi %s902_s15, %s1215_s15   ;;  %s856_s14 = sphi %s900_s14, %s1214_s14   ;;  %s852_s13 = sphi %s898_s13, %s1213_s13   ;;  %s848_s12 = sphi %s896_s12, %s1212_s12  }
   0x7   : > { %p40_p0 = scmp.ne.s32.totalorder %s852_s13, %s848_s12  ;;  %p1188_p1 = scmp.eq.s32.totalorder %s917_s16, 0 }
   0x8   : > { %p112_p3 = scmp.eq.s32.totalorder %s601_s17, 1  ;;  %p602_p5 = scmp.ge.s32.totalorder %s860_s15, 1 }
   0x9   : > { %p926_p4 = por %p1188_p1, %p40_p0  ;;  %p119_p7 = scmp.lt.s32.totalorder %s860_s15, 3 }
   0xa   : > { %p931_p6 = por %p112_p3, %p40_p0  ;;  %s862_s21 = smov [#allocation5]  }
   0xb   : > { %s1191_s18 = scalar_select %p926_p4, 1, 0 }
   0xc   : > { %s1192_s19 = scalar_select %p931_p6, 1, 0 }
   0xd   : > { %p936_p8 = pnand %p602_p5, %p119_p7  ;;  %s131_s22 = sshll.u32 %s862_s21, 4  ;;  %s940_s22 = int_to_ptr.vmem [resolvable:$true] %s131_s22 }
   0xe   : > { %s952_s24 = sadd.s32 1, %s860_s15   ;;  %s27_s25 = sadd.s32 1, %s856_s14 }
   0xf   : > { %s1193_s20 = scalar_select %p936_p8, 1, 0 }
  0x10   : > { %p631_p9 = pneg %p936_p8  ;;  %s24_s26 = ssub.s32 %s860_s15, %s952_s24 }
  0x11   : > { %s732_s29 = scalar_lea.hbm %s1185_s1, 128 }
  0x12   : > { %p947_p11 = pnand %p631_p9, %p1188_p1  ;;  %p733_p12 = scmp.ne.s32.totalorder %s1185_s1, %s732_s29 }
  0x13   : > { %p739_p5 = scmp.lt.u32.totalorder %s732_s29, %s1185_s1 }
  0x14   : > { %p734_p13 = pneg %p947_p11 }
  0x16   : > { %p735_p0 = pnand %p734_p13, %p733_p12 }
  0x18   : > { %p736_p3 = pneg %p735_p0 }
  0x1a   : > { %p741_p7 = pnand %p739_p5, %p736_p3 }
  0x1c   : > { %744 = shalt.err (!%p741_p7)
}
  0x1d   : > { %s745_s7 = scalar_lea.vmem %s940_s22, 128  ;;  %p753_p2 = scmp.lt.s32.totalorder %s940_s22, %s940_s22 }
  0x1e   : > { %p746_p9 = scmp.ne.s32.totalorder %s940_s22, %s745_s7  ;;  %p754_p6 = scmp.lt.s32.totalorder %s745_s7, %s745_s7 }
  0x20   : > { %p748_p10 = pnand %p746_p9, %p734_p13  ;;  %p755_p4 = por %p754_p6, %p753_p2 }
  0x22   : > { %p749_p1 = pneg %p748_p10 }
  0x24   : > { %p756_p8 = pnand %p755_p4, %p749_p1 }
  0x26   : > { %759 = shalt.err (!%p756_p8)
}
  0x27   : > { %s863_s8 = smov 64   ;;  %s864_s9 = smov 4  }
  0x28   : > { %634 = dma.hbm_to_vmem [thread:$0]  (!%p947_p11), %s1185_s1, 128, %s940_s22, [#allocation6], %s863_s8, %s863_s8, %s864_s9  }
  0x29   : > { %p25_p2 = scmp.eq.s32.totalorder %s24_s26, 0  ;;  %p34_p1 = scmp.ne.s32.totalorder %s856_s14, %s852_s13 }
  0x2a   : > { %p35_p4 = scmp.eq.s32.totalorder %s860_s15, 0  ;;  %p644_p6 = scmp.lt.s32.totalorder %s860_s15, 2 }
  0x2b   : > { %s983_s17 = scalar_select %p25_p2, %s856_s14, %s27_s25  }
  0x2c   : > { %p36_p8 = por %p35_p4, %p34_p1  ;;  %p1195_p10 = scmp.eq.s32.totalorder %s917_s16, 1 }
  0x2d   : > { %s148_s27 = sand.u32 1, %s856_s14   ;;  %s621_s28 = sshll.u32 %s860_s15, 8 }
  0x2e   : > { %p987_p12 = por %p1195_p10, %p34_p1  ;;  %s605_s29 = sshll.u32 %s148_s27, 4 }
  0x2f   : > { %s996_s4 = scalar_lea.hbm %s1184_s0, %s621_s28  ;;  %s152_s22 = scalar_lea.vmem [#allocation2], %s605_s29 }
  0x30   : > { %s160_s25 = sshll.u32 %s152_s22, 4  ;;  %p998_p11 = pnand %p644_p6, %p36_p8  ;;  %s1002_s25 = int_to_ptr.vmem [resolvable:$true] %s160_s25 }
  0x31   : > { %s149_s5 = scalar_lea.sflag [#allocation3], %s148_s27  ;;  %s760_s6 = scalar_lea.hbm %s996_s4, 256 }
  0x32   : > { %p761_p13 = scmp.ne.s32.totalorder %s996_s4, %s760_s6  ;;  %p762_p0 = pneg %p998_p11 }
  0x33   : > { %s765_s9 = scalar_lea.hbm %s1184_s0, 512  ;;  %p766_p7 = scmp.lt.u32.totalorder %s996_s4, %s1184_s0 }
  0x34   : > { %p763_p3 = pnand %p762_p0, %p761_p13  ;;  %p767_p9 = scmp.lt.u32.totalorder %s765_s9, %s760_s6 }
  0x35   : > { %p769_p1 = scmp.lt.u32.totalorder %s760_s6, %s996_s4 }
  0x36   : > { %p764_p5 = pneg %p763_p3  ;;  %p768_p2 = por %p767_p9, %p766_p7 }
  0x38   : > { %p770_p4 = por %p769_p1, %p768_p2 }
  0x3a   : > { %p771_p6 = pnand %p770_p4, %p764_p5 }
  0x3c   : > { %774 = shalt.err (!%p771_p6)
}
  0x3d   : > { %s775_s27 = scalar_lea.vmem %s1002_s25, 256  ;;  %s865_s28 = smov [#allocation2]  }
  0x3e   : > { %p776_p8 = scmp.ne.s32.totalorder %s1002_s25, %s775_s27  ;;  %s780_s29 = sshll.u32 %s865_s28, 4  ;;  %s781_s29 = int_to_ptr.vmem [resolvable:$false] %s780_s29 }
  0x3f   : > { %s782_s23 = scalar_lea.vmem %s781_s29, 512  ;;  %p783_p3 = scmp.lt.s32.totalorder %s1002_s25, %s781_s29 }
  0x40   : > { %p778_p10 = pnand %p776_p8, %p762_p0  ;;  %p784_p7 = scmp.lt.s32.totalorder %s782_s23, %s775_s27 }
  0x42   : > { %p779_p13 = pneg %p778_p10  ;;  %p785_p9 = por %p784_p7, %p783_p3 }
  0x44   : > { %p786_p2 = pnand %p785_p9, %p779_p13 }
  0x46   : > { %789 = shalt.err (!%p786_p2)
}
  0x47   : > { %638 = dma.hbm_to_vmem [thread:$0]  (!%p998_p11), %s996_s4, 256, %s1002_s25, %s149_s5  }
  0x48   : > { %p1198_p5 = scmp.ne.s32.totalorder %s1193_s20, 0 }
  0x49   : > { %s1032_s30 = sand.u32 (!%p1198_p5), 1, %s852_s13   ;;  %p1199_p0 = scmp.ne.s32.totalorder (!%p1198_p5), %s1191_s18, 0 }
  0x4a   : > { %169 = sbr.rel (%p1198_p5) target bundleno = 690 (0x2b2), region = 32  ;;  %s609_s22 = sshll.u32 (!%p1198_p5), %s1032_s30, 4 }
  0x4b   : > { %s172_s6 = scalar_lea.sflag (!%p1198_p5), [#allocation3], %s1032_s30  ;;  %s175_s7 = scalar_lea.vmem (!%p1198_p5), [#allocation2], %s609_s22 }
  0x51   : > { %835 = dma.done.wait (%p1199_p0), %s172_s6, 256  }
  0x52   : > { %837 = vsyncadd (%p1199_p0), %s172_s6, 4294967040  ;;  %p1200_p11 = scmp.eq.s32.totalorder %s917_s16, 0 }
  0x54   : > { %839 = dma.done.wait (%p1200_p11), [#allocation6], 128   ;;  %p1201_p1 = pmov %p1200_p11 }
  0x55   : > { %v1046_v0 = vld [vmem:[%s175_s7] sm:$0xff]  ;;  %v1048_v1 = vld [vmem:[%s175_s7 + $0x8] sm:$0xff]  ;;  %s866_s18 = smov 16   ;;  %s867_s20 = smov 1   ;;  %v874_v6 = vmov 0   ;;  %v207_v7 = vlaneseq  ;;  %vm257_vm0 = vcmask 130048  }
  0x56   : > { %841 = vsyncadd (%p1201_p1), [#allocation6], 4294967168  ;;  %v1051_v2 = vmax.f32 %v1046_v0, 0.0  ;;  %v1054_v3 = vmax.f32 %v1048_v1, 0.0  ;;  %s868_s4 = smov 17   ;;  %s869_s25 = smov 15   ;;  %440 = vmatprep.mubr.bf16.mxu0 %v874_v6  ;;  %493 = vmatprep.mubr.bf16.mxu1 %v874_v6 }
  0x57   : > { %s870_s26 = smov 127   ;;  %s871_s5 = smov 112   ;;  %v208_v8 = vand.u32 127, %v207_v7  ;;  %vm281_vm1 = vcmask 7168   ;;  %vm244_vm3 = vcmask 138240   ;;  %vm268_vm6 = vcmask 121856  }
  0x58   : > { %v691_v4 = vpack.i.bf16 %v1054_v3, %v1051_v2  ;;  %v711_v5 = vpack.i.bf16 %v1051_v2, %v1054_v3  ;;  %s872_s8 = smov 113   ;;  %s873_s9 = smov 111   ;;  %vm296_vm8 = vcmask 1039360   ;;  %vm358_vm9 = vcmask 1043456   ;;  %v731_v21 = vld [vmem:[#allocation5] sm:$0xff]  }
  0x59   : > { %v209_v9 = vadd.s32 128, %v208_v8  ;;  %v214_v10 = vand.u32 15, %v208_v8  ;;  %vm322_vm10 = vcmask 916480   ;;  %vm309_vm11 = vcmask 924672   ;;  %s622_s27 = sshll.u32 %s917_s16, 8  ;;  %s201_s28 = scalar_lea.vmem [#allocation7], %s609_s22 }
  0x5a   : > { %692 = vrot.lane.b32.xlu0 %v691_v4, %s866_s18  ;;  %702 = vrot.lane.b32.xlu1 %v691_v4, %s867_s20  ;;  %v291_v38 = vpack.c.bf16 %v1054_v3, %v1054_v3  ;;  %vm333_vm12 = vcmask 908288   ;;  %vm398_vm13 = vcmask 588800   ;;  %s521_s29 = sshll.u32 %s201_s28, 4  ;;  %s1140_s7 = scalar_lea.hbm %s1187_s3, %s622_s27  ;;  %s1142_s29 = int_to_ptr.vmem [resolvable:$true] %s521_s29 }
  0x5b   : > { %v221_v11 = vand.u32 15, %v209_v9  ;;  %vm1060_vm2 = vcmp.ge.s32.totalorder %v214_v10, 1  ;;  %vm1064_vm4 = vcmp.lt.s32.totalorder %v214_v10, 15  ;;  %s507_s16 = scalar_lea.sflag [#allocation4], %s1032_s30  ;;  %s790_s22 = scalar_lea.vmem %s1142_s29, 256 }
  0x5c   : > { %p791_p4 = scmp.ne.s32.totalorder %s1142_s29, %s790_s22  ;;  %s875_s18 = smov [#allocation7]  }
  0x5d   : > { %vm1068_vm5 = vcmp.ge.s32.totalorder %v221_v11, 1  ;;  %vm1072_vm7 = vcmp.lt.s32.totalorder %v221_v11, 15  ;;  %s794_s20 = sshll.u32 %s875_s18, 4  ;;  %s795_s20 = int_to_ptr.vmem [resolvable:$false] %s794_s20 }
  0x5e   : > { %697 = vrot.lane.b32.xlu0 %v691_v4, %s868_s4  ;;  %707 = vrot.lane.b32.xlu1 %v691_v4, %s869_s25  ;;  %p792_p6 = pnand %p791_p4, %p987_p12  ;;  %s796_s4 = scalar_lea.vmem %s795_s20, 512 }
  0x5f   : > { %p797_p10 = scmp.lt.s32.totalorder %s1142_s29, %s795_s20  ;;  %p798_p13 = scmp.lt.s32.totalorder %s796_s4, %s790_s22 }
  0x60   : > { %p793_p8 = pneg %p792_p6 }
  0x61   : > { %p799_p3 = por %p798_p13, %p797_p10 }
  0x62   : > { %712 = vrot.lane.b32.xlu0 %v711_v5, %s870_s26  ;;  %717 = vrot.lane.b32.xlu1 %v711_v5, %s871_s5 }
  0x63   : > { %p800_p7 = pnand %p799_p3, %p793_p8 }
  0x66   : > { %722 = vrot.lane.b32.xlu0 %v711_v5, %s872_s8  ;;  %727 = vrot.lane.b32.xlu1 %v691_v4, %s873_s9 }
  0xcc   : > { %v693_v12 = vpop.permute.xlu0 %692  ;;  %v703_v14 = vpop.permute.xlu1 %702 }
  0xcd   : > { %v695_v17 = vunpack.i.h.bf16 %v693_v12  ;;  %v694_v18 = vunpack.i.l.bf16 %v693_v12  ;;  %v705_v19 = vunpack.i.h.bf16 %v703_v14  ;;  %v704_v20 = vunpack.i.l.bf16 %v703_v14 }
  0xcf   : > { %v261_v22 = vsel %vm257_vm0, 0.0, %v694_v18  ;;  %v282_v23 = vsel %vm281_vm1, %v704_v20, %v705_v19  ;;  %v285_v24 = vsel %vm281_vm1, 0.0, %v704_v20  ;;  %v258_v25 = vsel %vm257_vm0, %v694_v18, %v695_v17 }
  0xd0   : > { %v262_v26 = vpack.c.bf16 %v261_v22, %v261_v22  ;;  %v286_v27 = vsel %vm1060_vm2, %v285_v24, 0.0  ;;  %v698_v28 = vpop.permute.xlu0 %697  ;;  %v708_v29 = vpop.permute.xlu1 %707  ;;  %v263_v30 = vpack.c.bf16 %v258_v25, %v258_v25  ;;  %v287_v31 = vsel %vm1068_vm5, %v282_v23, 0.0 }
  0xd1   : > { %v288_v32 = vpack.c.bf16 %v286_v27, %v286_v27  ;;  %v700_v33 = vunpack.i.h.bf16 %v698_v28  ;;  %v699_v34 = vunpack.i.l.bf16 %v698_v28  ;;  %v710_v35 = vunpack.i.h.bf16 %v708_v29 }
  0xd2   : > { %v709_v36 = vunpack.i.l.bf16 %v708_v29  ;;  %v289_v37 = vpack.c.bf16 %v287_v31, %v287_v31  ;;  %v344_v39 = vrot.slane %v262_v26, 4  ;;  %v345_v42 = vrot.slane %v263_v30, 4 }
  0xd3   : > { %v248_v40 = vsel %vm244_vm3, 0.0, %v699_v34  ;;  %v245_v41 = vsel %vm244_vm3, %v699_v34, %v700_v33  ;;  %v348_v49 = vrot.slane %v288_v32, 4  ;;  %v290_v32 = vpack.c.bf16 %v1051_v2, %v1051_v2 }
  0xd4   : > { %v249_v43 = vsel %vm1060_vm2, %v248_v40, 0.0  ;;  %v269_v44 = vsel %vm268_vm6, %v709_v36, %v710_v35  ;;  %v272_v45 = vsel %vm268_vm6, 0.0, %v709_v36  ;;  %v713_v46 = vpop.permute.xlu0 %712  ;;  %v250_v47 = vsel %vm1068_vm5, %v245_v41, 0.0  ;;  %v718_v48 = vpop.permute.xlu1 %717 }
  0xd5   : > { %v273_v50 = vsel %vm1064_vm4, %v272_v45, 0.0  ;;  %v714_v51 = vunpack.i.l.bf16 %v713_v46  ;;  %v252_v52 = vpack.c.bf16 %v250_v47, %v250_v47  ;;  %v715_v53 = vunpack.i.h.bf16 %v713_v46 }
  0xd6   : > { %v251_v54 = vpack.c.bf16 %v249_v43, %v249_v43  ;;  %v274_v55 = vsel %vm1072_vm7, %v269_v44, 0.0  ;;  %v349_v56 = vrot.slane %v289_v37, 4  ;;  %v275_v57 = vpack.c.bf16 %v273_v50, %v273_v50 }
  0xd7   : > { %v300_v58 = vsel %vm296_vm8, %v714_v51, 0.0  ;;  %v365_v59 = vsel %vm358_vm9, %v252_v52, %v345_v42  ;;  %v276_v60 = vpack.c.bf16 %v274_v55, %v274_v55  ;;  %v720_v63 = vunpack.i.h.bf16 %v718_v48  ;;  %v457_v52 = vld [vmem:[%s1186_s2] sm:$0xf] }
  0xd8   : > { %v302_v61 = vsel %vm1072_vm7, %v300_v58, 0.0  ;;  %408 = vmatprep.subr.bf16.mxu0 %v365_v59  ;;  %v361_v62 = vsel %vm358_vm9, %v251_v54, %v344_v39  ;;  %v719_v3 = vunpack.i.l.bf16 %v718_v48  ;;  %v723_v4 = vpop.permute.xlu0 %722  ;;  %v728_v5 = vpop.permute.xlu1 %727  ;;  %v297_v10 = vsel %vm296_vm8, %v715_v53, %v714_v51 }
  0xd9   : > { %v304_v6 = vpack.c.bf16 %v302_v61, %v302_v61  ;;  %409 = vmatpush1.bf16.msra.mxu0 %v361_v62  ;;  %v373_v7 = vsel %vm358_vm9, %v276_v60, %v349_v56  ;;  %v725_v8 = vunpack.i.h.bf16 %v723_v4  ;;  %v724_v9 = vunpack.i.l.bf16 %v723_v4 }
  0xda   : > { %410 = vmatprep.subr.bf16.mxu0 %v373_v7  ;;  %v323_v11 = vsel %vm322_vm10, %v720_v63, %v719_v3  ;;  %v326_v12 = vsel %vm322_vm10, %v719_v3, 0.0  ;;  %v730_v19 = vunpack.i.h.bf16 %v728_v5  ;;  %v369_v22 = vsel %vm358_vm9, %v275_v57, %v348_v49 }
  0xdb   : > { %v353_v14 = vrot.slane %v304_v6, 4  ;;  %v328_v17 = vpack.c.bf16 %v326_v12, %v326_v12  ;;  %v310_v18 = vsel %vm309_vm11, %v725_v8, %v724_v9  ;;  %v313_v20 = vsel %vm309_vm11, %v724_v9, 0.0 }
  0xdc   : > { %v729_v23 = vunpack.i.l.bf16 %v728_v5  ;;  %v327_v24 = vpack.c.bf16 %v323_v11, %v323_v11  ;;  %v315_v25 = vsel %vm1068_vm5, %v313_v20, 0.0  ;;  %v314_v28 = vsel %vm1060_vm2, %v310_v18, 0.0 }
  0xdd   : > { %411 = vmatpush1.bf16.msra.mxu0 %v369_v22  ;;  %v381_v26 = vsel %vm358_vm9, %v291_v38, %v353_v14  ;;  %v357_v27 = vrot.slane %v328_v17, 4  ;;  %v317_v29 = vpack.c.bf16 %v315_v25, %v315_v25  ;;  %v301_v30 = vsel %vm1064_vm4, %v297_v10, 0.0 }
  0xde   : > { %412 = vmatprep.subr.bf16.mxu0 %v381_v26  ;;  %v337_v31 = vsel %vm333_vm12, %v730_v19, 0.0  ;;  %v303_v33 = vpack.c.bf16 %v301_v30, %v301_v30  ;;  %v334_v34 = vsel %vm333_vm12, %v729_v23, %v730_v19  ;;  %v316_v35 = vpack.c.bf16 %v314_v28, %v314_v28 }
  0xdf   : > { %v356_v36 = vrot.slane %v327_v24, 4  ;;  %v339_v37 = vsel %vm1072_vm7, %v337_v31, 0.0  ;;  %v389_v13 = vsel %vm358_vm9, %v317_v29, %v357_v27  ;;  %v338_v38 = vsel %vm1064_vm4, %v334_v34, 0.0 }
  0xe0   : > { %v352_v16 = vrot.slane %v303_v33, 4  ;;  %v341_v40 = vpack.c.bf16 %v339_v37, %v339_v37  ;;  %v340_v41 = vpack.c.bf16 %v338_v38, %v338_v38 }
  0xe1   : > { %v385_v2 = vsel %vm358_vm9, %v316_v35, %v356_v36 }
  0xe2   : > { %v377_v39 = vsel %vm358_vm9, %v290_v32, %v352_v16  ;;  %v403_v42 = vsel %vm358_vm9, %v340_v41, 0 }
  0xe3   : > { %413 = vmatpush1.bf16.msra.mxu0 %v377_v39 }
  0xe4   : > { %414 = vmatprep.subr.bf16.mxu0 %v389_v13 }
  0xe7   : > { %415 = vmatpush1.bf16.msra.mxu0 %v385_v2 }
  0xe8   : > { %613 = vmatprep.subr.msk.bf16.mxu0 %vm358_vm9, %v341_v40 }
  0xeb   : > { %417 = vmatpush1.bf16.msra.mxu0 %v403_v42 }
  0xee   : > { %614 = vmatmul.mubr.msk.bf16.vlgmr.msra.gmra.mrb[0].mxu0 %vm398_vm13, %v731_v21 }
 0x1c1   : > { %v442_v15 = vpop.f32.mrb[0].mxu0 }
 0x1c2   : > { %v444_v43 = vpop.f32.mrb[1].mxu0  ;;  %v451_v45 = vmax.f32 %v442_v15, 0.0 }
 0x1c3   : > { %v446_v44 = vpop.f32.mrb[2].mxu0  ;;  %v452_v48 = vmax.f32 %v444_v43, 0.0 }
 0x1c4   : > { %v453_v46 = vmax.f32 %v446_v44, 0.0  ;;  %v448_v47 = vpop.f32.mrb[3].mxu0 }
 0x1c5   : > { %v454_v49 = vmax.f32 %v448_v47, 0.0 }
 0x1c6   : > { %v455_v50 = vpack.c.bf16 %v453_v46, %v451_v45 }
 0x1c7   : > { %v456_v51 = vpack.c.bf16 %v454_v49, %v452_v48 }
 0x1c9   : > { %461 = vmatprep.subr.bf16.mxu1 %v456_v51 }
 0x1ca   : > { %462 = vmatpush1.bf16.msra.mxu1 %v455_v50 }
 0x1cd   : > { %615 = vmatmul.mubr.msk.bf16.vlgmr.msra.gmra.mrb[0].mxu1 %vm257_vm0, %v457_v52 }
 0x2a0   : > { %v495_v53 = vpop.f32.mrb[0].mxu1 }
 0x2a1   : > { %v502_v54 = vadd.f32 %v495_v53, %v1046_v0  ;;  %v497_v55 = vpop.f32.mrb[1].mxu1 }
 0x2a2   : > { %v503_v56 = vadd.f32 %v497_v55, %v1048_v1  ;;  %v499_v57 = vpop.f32.mrb[2].mxu1 }
 0x2a3   : > { %504 = vst [vmem:[%s201_s28] sm:$0xff] %v502_v54  ;;  %v500_v58 = vpop.f32.mrb[3].mxu1 }
 0x2a4   : > { %505 = vst [vmem:[%s201_s28 + $0x8] sm:$0xff] %v503_v56 }
 0x2a5   : > { %803 = shalt.err (!%p800_p7)
}
 0x2a6   : > { %s804_s30 = scalar_lea.hbm %s1140_s7, 256  ;;  %s808_s5 = scalar_lea.hbm %s1187_s3, 512 }
 0x2a7   : > { %p805_p9 = scmp.ne.s32.totalorder %s1140_s7, %s804_s30  ;;  %p809_p0 = scmp.lt.u32.totalorder %s1140_s7, %s1187_s3 }
 0x2a8   : > { %p810_p11 = scmp.lt.u32.totalorder %s808_s5, %s804_s30  ;;  %p812_p4 = scmp.lt.u32.totalorder %s804_s30, %s1140_s7 }
 0x2a9   : > { %p806_p2 = pnand %p805_p9, %p987_p12 }
 0x2aa   : > { %p811_p1 = por %p810_p11, %p809_p0 }
 0x2ab   : > { %p807_p5 = pneg %p806_p2 }
 0x2ac   : > { %p813_p6 = por %p812_p4, %p811_p1 }
 0x2ae   : > { %p814_p8 = pnand %p813_p6, %p807_p5 }
 0x2b0   : > { %817 = shalt.err (!%p814_p8)
}
 0x2b1   : > { %629 = dma.vmem_to_hbm [thread:$0]  (%p987_p12), %s1142_s29, 256, %s1140_s7, %s507_s16  }
 0x2b2 PF: > { %s533_s10 = sand.u32 1, %s848_s12   ;;  %p1210_p10 = scmp.ne.s32.totalorder %s1192_s19, 0 }
 0x2b3   : > { %p1211_p13 = scmp.ge.s32.totalorder %s860_s15, 2  ;;  %s534_s11 = scalar_lea.sflag [#allocation4], %s533_s10 }
 0x2b5   : > { %p640_p3 = pnand %p1211_p13, %p1210_p10 }
 0x2b7   : > { %843 = dma.done.wait (!%p640_p3), %s534_s11, 256  }
 0x2b8   : > { %845 = vsyncadd (!%p640_p3), %s534_s11, 4294967040  ;;  %p17_p7 = scmp.ge.s32.totalorder %s952_s24, 4   ;;  %s1212_s12 = smov %s852_s13 }
 0x2b9   : > { %s1213_s13 = smov %s856_s14  ;;  %s1214_s14 = smov %s983_s17 }
 0x2ba   : > { %s1215_s15 = smov %s952_s24  ;;  %19 = sbr.rel (!%p17_p7) target bundleno = 6 (0x6), region = 81 }
 0x2c1   :  { %539 = vsyncpa [#allocation3], 1 }
 0x2c2   :  { %541 = vsyncpa [#allocation3 + $0x1], 1 }
 0x2c3   :  { %542 = vsyncpa [#allocation6], 1 }
 0x2c4   :  { %543 = vsyncpa [#allocation4], 1 }
 0x2c5   :  { %545 = vsyncpa [#allocation4 + $0x1], 1 }

// kernel: tpu_custom_call.1
= control target key start
LH: loop header
LB: loop body
LE: loop exit
PB: predicated region body
PF: predicated region fallthrough
CT: control target
= control target key end

     0   :  { %8 = vsyncpa [#allocation3], 0  ;;  %s1184_s0 = inlined_call_operand.hbm [shape: f32[2,8,256], index: 0, kind: input, shape index: {}]   ;;  %s1185_s1 = inlined_call_operand.hbm [shape: bf16[16,72], index: 1, kind: input, shape index: {}]   ;;  %s1186_s2 = inlined_call_operand.vmem [shape: bf16[8,16], index: 2, kind: input, shape index: {}]   ;;  %s1187_s3 = inlined_call_operand.hbm [shape: f32[2,8,256], index: 3, kind: output, shape index: {}]  }
   0x1   :  { %10 = vsyncpa [#allocation3 + $0x1], 0 }
   0x2   :  { %11 = vsyncpa [#allocation6], 0 }
   0x3   :  { %12 = vsyncpa [#allocation4], 0 }
   0x4   :  { %14 = vsyncpa [#allocation4 + $0x1], 0  ;;  %s896_s12 = smov 0   ;;  %s898_s13 = smov 0  }
   0x5   :  { %s900_s14 = smov 0   ;;  %s902_s15 = smov 0  }
   0x6 LB: > { %s917_s16 = sadd.s32 4294967295, %s860_s15   ;;  %s601_s17 = sadd.s32 4294967294, %s860_s15   ;;  %s860_s15 = sphi %s902_s15, %s1215_s15   ;;  %s856_s14 = sphi %s900_s14, %s1214_s14   ;;  %s852_s13 = sphi %s898_s13, %s1213_s13   ;;  %s848_s12 = sphi %s896_s12, %s1212_s12  }
   0x7   : > { %p40_p0 = scmp.ne.s32.totalorder %s852_s13, %s848_s12  ;;  %p1188_p1 = scmp.eq.s32.totalorder %s917_s16, 0 }
   0x8   : > { %p112_p3 = scmp.eq.s32.totalorder %s601_s17, 1  ;;  %p602_p5 = scmp.ge.s32.totalorder %s860_s15, 1 }
   0x9   : > { %p926_p4 = por %p1188_p1, %p40_p0  ;;  %p119_p7 = scmp.lt.s32.totalorder %s860_s15, 3 }
   0xa   : > { %p931_p6 = por %p112_p3, %p40_p0  ;;  %s862_s21 = smov [#allocation5]  }
   0xb   : > { %s1191_s18 = scalar_select %p926_p4, 1, 0 }
   0xc   : > { %s1192_s19 = scalar_select %p931_p6, 1, 0 }
   0xd   : > { %p936_p8 = pnand %p602_p5, %p119_p7  ;;  %s131_s22 = sshll.u32 %s862_s21, 4  ;;  %s940_s22 = int_to_ptr.vmem [resolvable:$true] %s131_s22 }
   0xe   : > { %s952_s24 = sadd.s32 1, %s860_s15   ;;  %s27_s25 = sadd.s32 1, %s856_s14 }
   0xf   : > { %s1193_s20 = scalar_select %p936_p8, 1, 0 }
  0x10   : > { %p631_p9 = pneg %p936_p8  ;;  %s24_s26 = ssub.s32 %s860_s15, %s952_s24 }
  0x11   : > { %s732_s29 = scalar_lea.hbm %s1185_s1, 128 }
  0x12   : > { %p947_p11 = pnand %p631_p9, %p1188_p1  ;;  %p733_p12 = scmp.ne.s32.totalorder %s1185_s1, %s732_s29 }
  0x13   : > { %p739_p5 = scmp.lt.u32.totalorder %s732_s29, %s1185_s1 }
  0x14   : > { %p734_p13 = pneg %p947_p11 }
  0x16   : > { %p735_p0 = pnand %p734_p13, %p733_p12 }
  0x18   : > { %p736_p3 = pneg %p735_p0 }
  0x1a   : > { %p741_p7 = pnand %p739_p5, %p736_p3 }
  0x1c   : > { %744 = shalt.err (!%p741_p7)
}
  0x1d   : > { %s745_s7 = scalar_lea.vmem %s940_s22, 128  ;;  %p753_p2 = scmp.lt.s32.totalorder %s940_s22, %s940_s22 }
  0x1e   : > { %p746_p9 = scmp.ne.s32.totalorder %s940_s22, %s745_s7  ;;  %p754_p6 = scmp.lt.s32.totalorder %s745_s7, %s745_s7 }
  0x20   : > { %p748_p10 = pnand %p746_p9, %p734_p13  ;;  %p755_p4 = por %p754_p6, %p753_p2 }
  0x22   : > { %p749_p1 = pneg %p748_p10 }
  0x24   : > { %p756_p8 = pnand %p755_p4, %p749_p1 }
  0x26   : > { %759 = shalt.err (!%p756_p8)
}
  0x27   : > { %s863_s8 = smov 64   ;;  %s864_s9 = smov 4  }
  0x28   : > { %634 = dma.hbm_to_vmem [thread:$0]  (!%p947_p11), %s1185_s1, 128, %s940_s22, [#allocation6], %s863_s8, %s863_s8, %s864_s9  }
  0x29   : > { %p25_p2 = scmp.eq.s32.totalorder %s24_s26, 0  ;;  %p34_p1 = scmp.ne.s32.totalorder %s856_s14, %s852_s13 }
  0x2a   : > { %p35_p4 = scmp.eq.s32.totalorder %s860_s15, 0  ;;  %p644_p6 = scmp.lt.s32.totalorder %s860_s15, 2 }
  0x2b   : > { %s983_s17 = scalar_select %p25_p2, %s856_s14, %s27_s25  }
  0x2c   : > { %p36_p8 = por %p35_p4, %p34_p1  ;;  %p1195_p10 = scmp.eq.s32.totalorder %s917_s16, 1 }
  0x2d   : > { %s148_s27 = sand.u32 1, %s856_s14   ;;  %s621_s28 = sshll.u32 %s860_s15, 8 }
  0x2e   : > { %p987_p12 = por %p1195_p10, %p34_p1  ;;  %s605_s29 = sshll.u32 %s148_s27, 4 }
  0x2f   : > { %s996_s4 = scalar_lea.hbm %s1184_s0, %s621_s28  ;;  %s152_s22 = scalar_lea.vmem [#allocation2], %s605_s29 }
  0x30   : > { %s160_s25 = sshll.u32 %s152_s22, 4  ;;  %p998_p11 = pnand %p644_p6, %p36_p8  ;;  %s1002_s25 = int_to_ptr.vmem [resolvable:$true] %s160_s25 }
  0x31   : > { %s149_s5 = scalar_lea.sflag [#allocation3], %s148_s27  ;;  %s760_s6 = scalar_lea.hbm %s996_s4, 256 }
  0x32   : > { %p761_p13 = scmp.ne.s32.totalorder %s996_s4, %s760_s6  ;;  %p762_p0 = pneg %p998_p11 }
  0x33   : > { %s765_s9 = scalar_lea.hbm %s1184_s0, 512  ;;  %p766_p7 = scmp.lt.u32.totalorder %s996_s4, %s1184_s0 }
  0x34   : > { %p763_p3 = pnand %p762_p0, %p761_p13  ;;  %p767_p9 = scmp.lt.u32.totalorder %s765_s9, %s760_s6 }
  0x35   : > { %p769_p1 = scmp.lt.u32.totalorder %s760_s6, %s996_s4 }
  0x36   : > { %p764_p5 = pneg %p763_p3  ;;  %p768_p2 = por %p767_p9, %p766_p7 }
  0x38   : > { %p770_p4 = por %p769_p1, %p768_p2 }
  0x3a   : > { %p771_p6 = pnand %p770_p4, %p764_p5 }
  0x3c   : > { %774 = shalt.err (!%p771_p6)
}
  0x3d   : > { %s775_s27 = scalar_lea.vmem %s1002_s25, 256  ;;  %s865_s28 = smov [#allocation2]  }
  0x3e   : > { %p776_p8 = scmp.ne.s32.totalorder %s1002_s25, %s775_s27  ;;  %s780_s29 = sshll.u32 %s865_s28, 4  ;;  %s781_s29 = int_to_ptr.vmem [resolvable:$false] %s780_s29 }
  0x3f   : > { %s782_s23 = scalar_lea.vmem %s781_s29, 512  ;;  %p783_p3 = scmp.lt.s32.totalorder %s1002_s25, %s781_s29 }
  0x40   : > { %p778_p10 = pnand %p776_p8, %p762_p0  ;;  %p784_p7 = scmp.lt.s32.totalorder %s782_s23, %s775_s27 }
  0x42   : > { %p779_p13 = pneg %p778_p10  ;;  %p785_p9 = por %p784_p7, %p783_p3 }
  0x44   : > { %p786_p2 = pnand %p785_p9, %p779_p13 }
  0x46   : > { %789 = shalt.err (!%p786_p2)
}
  0x47   : > { %638 = dma.hbm_to_vmem [thread:$0]  (!%p998_p11), %s996_s4, 256, %s1002_s25, %s149_s5  }
  0x48   : > { %p1198_p5 = scmp.ne.s32.totalorder %s1193_s20, 0 }
  0x49   : > { %s1032_s30 = sand.u32 (!%p1198_p5), 1, %s852_s13   ;;  %p1199_p0 = scmp.ne.s32.totalorder (!%p1198_p5), %s1191_s18, 0 }
  0x4a   : > { %169 = sbr.rel (%p1198_p5) target bundleno = 690 (0x2b2), region = 32  ;;  %s609_s22 = sshll.u32 (!%p1198_p5), %s1032_s30, 4 }
  0x4b   : > { %s172_s6 = scalar_lea.sflag (!%p1198_p5), [#allocation3], %s1032_s30  ;;  %s175_s7 = scalar_lea.vmem (!%p1198_p5), [#allocation2], %s609_s22 }
  0x51   : > { %835 = dma.done.wait (%p1199_p0), %s172_s6, 256  }
  0x52   : > { %837 = vsyncadd (%p1199_p0), %s172_s6, 4294967040  ;;  %p1200_p11 = scmp.eq.s32.totalorder %s917_s16, 0 }
  0x54   : > { %839 = dma.done.wait (%p1200_p11), [#allocation6], 128   ;;  %p1201_p1 = pmov %p1200_p11 }
  0x55   : > { %v1046_v0 = vld [vmem:[%s175_s7] sm:$0xff]  ;;  %v1048_v1 = vld [vmem:[%s175_s7 + $0x8] sm:$0xff]  ;;  %s866_s18 = smov 16   ;;  %s867_s20 = smov 1   ;;  %v874_v6 = vmov 0   ;;  %v207_v7 = vlaneseq  ;;  %vm257_vm0 = vcmask 130048  }
  0x56   : > { %841 = vsyncadd (%p1201_p1), [#allocation6], 4294967168  ;;  %v1051_v2 = vmax.f32 %v1046_v0, 0.0  ;;  %v1054_v3 = vmax.f32 %v1048_v1, 0.0  ;;  %s868_s4 = smov 17   ;;  %s869_s25 = smov 15   ;;  %440 = vmatprep.mubr.bf16.mxu0 %v874_v6  ;;  %493 = vmatprep.mubr.bf16.mxu1 %v874_v6 }
  0x57   : > { %s870_s26 = smov 127   ;;  %s871_s5 = smov 112   ;;  %v208_v8 = vand.u32 127, %v207_v7  ;;  %vm281_vm1 = vcmask 7168   ;;  %vm244_vm3 = vcmask 138240   ;;  %vm268_vm6 = vcmask 121856  }
  0x58   : > { %v691_v4 = vpack.i.bf16 %v1054_v3, %v1051_v2  ;;  %v711_v5 = vpack.i.bf16 %v1051_v2, %v1054_v3  ;;  %s872_s8 = smov 113   ;;  %s873_s9 = smov 111   ;;  %vm296_vm8 = vcmask 1039360   ;;  %vm358_vm9 = vcmask 1043456   ;;  %v731_v21 = vld [vmem:[#allocation5] sm:$0xff]  }
  0x59   : > { %v209_v9 = vadd.s32 128, %v208_v8  ;;  %v214_v10 = vand.u32 15, %v208_v8  ;;  %vm322_vm10 = vcmask 916480   ;;  %vm309_vm11 = vcmask 924672   ;;  %s622_s27 = sshll.u32 %s917_s16, 8  ;;  %s201_s28 = scalar_lea.vmem [#allocation7], %s609_s22 }
  0x5a   : > { %692 = vrot.lane.b32.xlu0 %v691_v4, %s866_s18  ;;  %702 = vrot.lane.b32.xlu1 %v691_v4, %s867_s20  ;;  %v291_v38 = vpack.c.bf16 %v1054_v3, %v1054_v3  ;;  %vm333_vm12 = vcmask 908288   ;;  %vm398_vm13 = vcmask 588800   ;;  %s521_s29 = sshll.u32 %s201_s28, 4  ;;  %s1140_s7 = scalar_lea.hbm %s1187_s3, %s622_s27  ;;  %s1142_s29 = int_to_ptr.vmem [resolvable:$true] %s521_s29 }
  0x5b   : > { %v221_v11 = vand.u32 15, %v209_v9  ;;  %vm1060_vm2 = vcmp.ge.s32.totalorder %v214_v10, 1  ;;  %vm1064_vm4 = vcmp.lt.s32.totalorder %v214_v10, 15  ;;  %s507_s16 = scalar_lea.sflag [#allocation4], %s1032_s30  ;;  %s790_s22 = scalar_lea.vmem %s1142_s29, 256 }
  0x5c   : > { %p791_p4 = scmp.ne.s32.totalorder %s1142_s29, %s790_s22  ;;  %s875_s18 = smov [#allocation7]  }
  0x5d   : > { %vm1068_vm5 = vcmp.ge.s32.totalorder %v221_v11, 1  ;;  %vm1072_vm7 = vcmp.lt.s32.totalorder %v221_v11, 15  ;;  %s794_s20 = sshll.u32 %s875_s18, 4  ;;  %s795_s20 = int_to_ptr.vmem [resolvable:$false] %s794_s20 }
  0x5e   : > { %697 = vrot.lane.b32.xlu0 %v691_v4, %s868_s4  ;;  %707 = vrot.lane.b32.xlu1 %v691_v4, %s869_s25  ;;  %p792_p6 = pnand %p791_p4, %p987_p12  ;;  %s796_s4 = scalar_lea.vmem %s795_s20, 512 }
  0x5f   : > { %p797_p10 = scmp.lt.s32.totalorder %s1142_s29, %s795_s20  ;;  %p798_p13 = scmp.lt.s32.totalorder %s796_s4, %s790_s22 }
  0x60   : > { %p793_p8 = pneg %p792_p6 }
  0x61   : > { %p799_p3 = por %p798_p13, %p797_p10 }
  0x62   : > { %712 = vrot.lane.b32.xlu0 %v711_v5, %s870_s26  ;;  %717 = vrot.lane.b32.xlu1 %v711_v5, %s871_s5 }
  0x63   : > { %p800_p7 = pnand %p799_p3, %p793_p8 }
  0x66   : > { %722 = vrot.lane.b32.xlu0 %v711_v5, %s872_s8  ;;  %727 = vrot.lane.b32.xlu1 %v691_v4, %s873_s9 }
  0xcc   : > { %v693_v12 = vpop.permute.xlu0 %692  ;;  %v703_v14 = vpop.permute.xlu1 %702 }
  0xcd   : > { %v695_v17 = vunpack.i.h.bf16 %v693_v12  ;;  %v694_v18 = vunpack.i.l.bf16 %v693_v12  ;;  %v705_v19 = vunpack.i.h.bf16 %v703_v14  ;;  %v704_v20 = vunpack.i.l.bf16 %v703_v14 }
  0xcf   : > { %v261_v22 = vsel %vm257_vm0, 0.0, %v694_v18  ;;  %v282_v23 = vsel %vm281_vm1, %v704_v20, %v705_v19  ;;  %v285_v24 = vsel %vm281_vm1, 0.0, %v704_v20  ;;  %v258_v25 = vsel %vm257_vm0, %v694_v18, %v695_v17 }
  0xd0   : > { %v262_v26 = vpack.c.bf16 %v261_v22, %v261_v22  ;;  %v286_v27 = vsel %vm1060_vm2, %v285_v24, 0.0  ;;  %v698_v28 = vpop.permute.xlu0 %697  ;;  %v708_v29 = vpop.permute.xlu1 %707  ;;  %v263_v30 = vpack.c.bf16 %v258_v25, %v258_v25  ;;  %v287_v31 = vsel %vm1068_vm5, %v282_v23, 0.0 }
  0xd1   : > { %v288_v32 = vpack.c.bf16 %v286_v27, %v286_v27  ;;  %v700_v33 = vunpack.i.h.bf16 %v698_v28  ;;  %v699_v34 = vunpack.i.l.bf16 %v698_v28  ;;  %v710_v35 = vunpack.i.h.bf16 %v708_v29 }
  0xd2   : > { %v709_v36 = vunpack.i.l.bf16 %v708_v29  ;;  %v289_v37 = vpack.c.bf16 %v287_v31, %v287_v31  ;;  %v344_v39 = vrot.slane %v262_v26, 4  ;;  %v345_v42 = vrot.slane %v263_v30, 4 }
  0xd3   : > { %v248_v40 = vsel %vm244_vm3, 0.0, %v699_v34  ;;  %v245_v41 = vsel %vm244_vm3, %v699_v34, %v700_v33  ;;  %v348_v49 = vrot.slane %v288_v32, 4  ;;  %v290_v32 = vpack.c.bf16 %v1051_v2, %v1051_v2 }
  0xd4   : > { %v249_v43 = vsel %vm1060_vm2, %v248_v40, 0.0  ;;  %v269_v44 = vsel %vm268_vm6, %v709_v36, %v710_v35  ;;  %v272_v45 = vsel %vm268_vm6, 0.0, %v709_v36  ;;  %v713_v46 = vpop.permute.xlu0 %712  ;;  %v250_v47 = vsel %vm1068_vm5, %v245_v41, 0.0  ;;  %v718_v48 = vpop.permute.xlu1 %717 }
  0xd5   : > { %v273_v50 = vsel %vm1064_vm4, %v272_v45, 0.0  ;;  %v714_v51 = vunpack.i.l.bf16 %v713_v46  ;;  %v252_v52 = vpack.c.bf16 %v250_v47, %v250_v47  ;;  %v715_v53 = vunpack.i.h.bf16 %v713_v46 }
  0xd6   : > { %v251_v54 = vpack.c.bf16 %v249_v43, %v249_v43  ;;  %v274_v55 = vsel %vm1072_vm7, %v269_v44, 0.0  ;;  %v349_v56 = vrot.slane %v289_v37, 4  ;;  %v275_v57 = vpack.c.bf16 %v273_v50, %v273_v50 }
  0xd7   : > { %v300_v58 = vsel %vm296_vm8, %v714_v51, 0.0  ;;  %v365_v59 = vsel %vm358_vm9, %v252_v52, %v345_v42  ;;  %v276_v60 = vpack.c.bf16 %v274_v55, %v274_v55  ;;  %v720_v63 = vunpack.i.h.bf16 %v718_v48  ;;  %v457_v52 = vld [vmem:[%s1186_s2] sm:$0xf] }
  0xd8   : > { %v302_v61 = vsel %vm1072_vm7, %v300_v58, 0.0  ;;  %408 = vmatprep.subr.bf16.mxu0 %v365_v59  ;;  %v361_v62 = vsel %vm358_vm9, %v251_v54, %v344_v39  ;;  %v719_v3 = vunpack.i.l.bf16 %v718_v48  ;;  %v723_v4 = vpop.permute.xlu0 %722  ;;  %v728_v5 = vpop.permute.xlu1 %727  ;;  %v297_v10 = vsel %vm296_vm8, %v715_v53, %v714_v51 }
  0xd9   : > { %v304_v6 = vpack.c.bf16 %v302_v61, %v302_v61  ;;  %409 = vmatpush1.bf16.msra.mxu0 %v361_v62  ;;  %v373_v7 = vsel %vm358_vm9, %v276_v60, %v349_v56  ;;  %v725_v8 = vunpack.i.h.bf16 %v723_v4  ;;  %v724_v9 = vunpack.i.l.bf16 %v723_v4 }
  0xda   : > { %410 = vmatprep.subr.bf16.mxu0 %v373_v7  ;;  %v323_v11 = vsel %vm322_vm10, %v720_v63, %v719_v3  ;;  %v326_v12 = vsel %vm322_vm10, %v719_v3, 0.0  ;;  %v730_v19 = vunpack.i.h.bf16 %v728_v5  ;;  %v369_v22 = vsel %vm358_vm9, %v275_v57, %v348_v49 }
  0xdb   : > { %v353_v14 = vrot.slane %v304_v6, 4  ;;  %v328_v17 = vpack.c.bf16 %v326_v12, %v326_v12  ;;  %v310_v18 = vsel %vm309_vm11, %v725_v8, %v724_v9  ;;  %v313_v20 = vsel %vm309_vm11, %v724_v9, 0.0 }
  0xdc   : > { %v729_v23 = vunpack.i.l.bf16 %v728_v5  ;;  %v327_v24 = vpack.c.bf16 %v323_v11, %v323_v11  ;;  %v315_v25 = vsel %vm1068_vm5, %v313_v20, 0.0  ;;  %v314_v28 = vsel %vm1060_vm2, %v310_v18, 0.0 }
  0xdd   : > { %411 = vmatpush1.bf16.msra.mxu0 %v369_v22  ;;  %v381_v26 = vsel %vm358_vm9, %v291_v38, %v353_v14  ;;  %v357_v27 = vrot.slane %v328_v17, 4  ;;  %v317_v29 = vpack.c.bf16 %v315_v25, %v315_v25  ;;  %v301_v30 = vsel %vm1064_vm4, %v297_v10, 0.0 }
  0xde   : > { %412 = vmatprep.subr.bf16.mxu0 %v381_v26  ;;  %v337_v31 = vsel %vm333_vm12, %v730_v19, 0.0  ;;  %v303_v33 = vpack.c.bf16 %v301_v30, %v301_v30  ;;  %v334_v34 = vsel %vm333_vm12, %v729_v23, %v730_v19  ;;  %v316_v35 = vpack.c.bf16 %v314_v28, %v314_v28 }
  0xdf   : > { %v356_v36 = vrot.slane %v327_v24, 4  ;;  %v339_v37 = vsel %vm1072_vm7, %v337_v31, 0.0  ;;  %v389_v13 = vsel %vm358_vm9, %v317_v29, %v357_v27  ;;  %v338_v38 = vsel %vm1064_vm4, %v334_v34, 0.0 }
  0xe0   : > { %v352_v16 = vrot.slane %v303_v33, 4  ;;  %v341_v40 = vpack.c.bf16 %v339_v37, %v339_v37  ;;  %v340_v41 = vpack.c.bf16 %v338_v38, %v338_v38 }
  0xe1   : > { %v385_v2 = vsel %vm358_vm9, %v316_v35, %v356_v36 }
  0xe2   : > { %v377_v39 = vsel %vm358_vm9, %v290_v32, %v352_v16  ;;  %v403_v42 = vsel %vm358_vm9, %v340_v41, 0 }
  0xe3   : > { %413 = vmatpush1.bf16.msra.mxu0 %v377_v39 }
  0xe4   : > { %414 = vmatprep.subr.bf16.mxu0 %v389_v13 }
  0xe7   : > { %415 = vmatpush1.bf16.msra.mxu0 %v385_v2 }
  0xe8   : > { %613 = vmatprep.subr.msk.bf16.mxu0 %vm358_vm9, %v341_v40 }
  0xeb   : > { %417 = vmatpush1.bf16.msra.mxu0 %v403_v42 }
  0xee   : > { %614 = vmatmul.mubr.msk.bf16.vlgmr.msra.gmra.mrb[0].mxu0 %vm398_vm13, %v731_v21 }
 0x1c1   : > { %v442_v15 = vpop.f32.mrb[0].mxu0 }
 0x1c2   : > { %v444_v43 = vpop.f32.mrb[1].mxu0  ;;  %v451_v45 = vmax.f32 %v442_v15, 0.0 }
 0x1c3   : > { %v446_v44 = vpop.f32.mrb[2].mxu0  ;;  %v452_v48 = vmax.f32 %v444_v43, 0.0 }
 0x1c4   : > { %v453_v46 = vmax.f32 %v446_v44, 0.0  ;;  %v448_v47 = vpop.f32.mrb[3].mxu0 }
 0x1c5   : > { %v454_v49 = vmax.f32 %v448_v47, 0.0 }
 0x1c6   : > { %v455_v50 = vpack.c.bf16 %v453_v46, %v451_v45 }
 0x1c7   : > { %v456_v51 = vpack.c.bf16 %v454_v49, %v452_v48 }
 0x1c9   : > { %461 = vmatprep.subr.bf16.mxu1 %v456_v51 }
 0x1ca   : > { %462 = vmatpush1.bf16.msra.mxu1 %v455_v50 }
 0x1cd   : > { %615 = vmatmul.mubr.msk.bf16.vlgmr.msra.gmra.mrb[0].mxu1 %vm257_vm0, %v457_v52 }
 0x2a0   : > { %v495_v53 = vpop.f32.mrb[0].mxu1 }
 0x2a1   : > { %v502_v54 = vadd.f32 %v495_v53, %v1046_v0  ;;  %v497_v55 = vpop.f32.mrb[1].mxu1 }
 0x2a2   : > { %v503_v56 = vadd.f32 %v497_v55, %v1048_v1  ;;  %v499_v57 = vpop.f32.mrb[2].mxu1 }
 0x2a3   : > { %504 = vst [vmem:[%s201_s28] sm:$0xff] %v502_v54  ;;  %v500_v58 = vpop.f32.mrb[3].mxu1 }
 0x2a4   : > { %505 = vst [vmem:[%s201_s28 + $0x8] sm:$0xff] %v503_v56 }
 0x2a5   : > { %803 = shalt.err (!%p800_p7)
}
 0x2a6   : > { %s804_s30 = scalar_lea.hbm %s1140_s7, 256  ;;  %s808_s5 = scalar_lea.hbm %s1187_s3, 512 }
 0x2a7   : > { %p805_p9 = scmp.ne.s32.totalorder %s1140_s7, %s804_s30  ;;  %p809_p0 = scmp.lt.u32.totalorder %s1140_s7, %s1187_s3 }
 0x2a8   : > { %p810_p11 = scmp.lt.u32.totalorder %s808_s5, %s804_s30  ;;  %p812_p4 = scmp.lt.u32.totalorder %s804_s30, %s1140_s7 }
 0x2a9   : > { %p806_p2 = pnand %p805_p9, %p987_p12 }
 0x2aa   : > { %p811_p1 = por %p810_p11, %p809_p0 }
 0x2ab   : > { %p807_p5 = pneg %p806_p2 }
 0x2ac   : > { %p813_p6 = por %p812_p4, %p811_p1 }
 0x2ae   : > { %p814_p8 = pnand %p813_p6, %p807_p5 }
 0x2b0   : > { %817 = shalt.err (!%p814_p8)
}
 0x2b1   : > { %629 = dma.vmem_to_hbm [thread:$0]  (%p987_p12), %s1142_s29, 256, %s1140_s7, %s507_s16  }
 0x2b2 PF: > { %s533_s10 = sand.u32 1, %s848_s12   ;;  %p1210_p10 = scmp.ne.s32.totalorder %s1192_s19, 0 }
 0x2b3   : > { %p1211_p13 = scmp.ge.s32.totalorder %s860_s15, 2  ;;  %s534_s11 = scalar_lea.sflag [#allocation4], %s533_s10 }
 0x2b5   : > { %p640_p3 = pnand %p1211_p13, %p1210_p10 }
 0x2b7   : > { %843 = dma.done.wait (!%p640_p3), %s534_s11, 256  }
 0x2b8   : > { %845 = vsyncadd (!%p640_p3), %s534_s11, 4294967040  ;;  %p17_p7 = scmp.ge.s32.totalorder %s952_s24, 4   ;;  %s1212_s12 = smov %s852_s13 }
 0x2b9   : > { %s1213_s13 = smov %s856_s14  ;;  %s1214_s14 = smov %s983_s17 }
 0x2ba   : > { %s1215_s15 = smov %s952_s24  ;;  %19 = sbr.rel (!%p17_p7) target bundleno = 6 (0x6), region = 81 }
 0x2c1   :  { %539 = vsyncpa [#allocation3], 1 }
 0x2c2   :  { %541 = vsyncpa [#allocation3 + $0x1], 1 }
 0x2c3   :  { %542 = vsyncpa [#allocation6], 1 }
 0x2c4   :  { %543 = vsyncpa [#allocation4], 1 }
 0x2c5   :  { %545 = vsyncpa [#allocation4 + $0x1], 1 }

</bundles_post_ra>
